<compile_context>
chip_gen: v6e
topology: v6e:2x2x1
jax: 0.10.0
libtpu: 0.0.40
codegen_flags: <defaults>
</compile_context>

<pallas_src>
import jax
import jax.numpy as jnp
from jax import lax
from jax.experimental import pallas as pl
from jax.experimental.pallas import tpu as pltpu

EPS = 1e-5
LANE = 128
# Rows of the (M, K) patch matrix per grid step.  256 here so the toy demo
# exercises multi-tile pipelining and the cross-tile BN statistics; use
# 512-2048 for real ResNet shapes (keep 2*(M_TILE*K*2B + M_TILE*Cp*4B) under
# ~24 MiB so the same tiling fits v7x's 64 MiB physical / 32 MiB scoped VMEM).
M_TILE = 256
VMEM_LIMIT = 32 * 1024 * 1024


def _round_up(x, m):
    return (x + m - 1) // m * m


def _matmul_stats_kernel(p_ref, w_ref, y_ref, stats_ref):
    """One M-tile: conv-as-matmul on the MXU (bf16 operands, f32 accumulation)
    plus per-channel partial sum / sum-of-squares for the BN statistics."""
    y = jnp.dot(p_ref[...], w_ref[...], preferred_element_type=jnp.float32)
    y_ref[...] = y
    s = jnp.sum(y, axis=0, keepdims=True)           # (1, Cp) f32
    sq = jnp.sum(y * y, axis=0, keepdims=True)      # (1, Cp) f32
    # Pack the two stats rows into one full (8, Cp) store (sublane-aligned).
    row = lax.broadcasted_iota(jnp.int32, (8, 1), 0)
    stats_ref[...] = jnp.where(row == 0, s, jnp.where(row == 1, sq, 0.0))


def _affine_relu_kernel(y_ref, scale_ref, shift_ref, o_ref):
    """out = relu(y * scale + shift); BN folded into per-channel scale/shift."""
    o_ref[...] = jnp.maximum(y_ref[...] * scale_ref[...] + shift_ref[...], 0.0)


def _im2col(x_nhwc, stride):
    n, h, w, c = x_nhwc.shape
    xp = jnp.pad(x_nhwc, ((0, 0), (1, 1), (1, 1), (0, 0)))
    h_out = (h + 2 - 3) // stride + 1
    w_out = (w + 2 - 3) // stride + 1
    cols = []
    for kh in range(3):
        for kw in range(3):
            sl = xp[:, kh:kh + (h_out - 1) * stride + 1:stride,
                    kw:kw + (w_out - 1) * stride + 1:stride, :]
            cols.append(sl)
    # (N, Ho, Wo, 9*C), patch elements ordered (kh, kw, cin)
    patches = jnp.concatenate(cols, axis=-1)
    return patches.reshape(n * h_out * w_out, 9 * c), (n, h_out, w_out)


def conv_bn_relu(x_nhwc, w_oihw, gamma, beta, stride):
    patches, (n, ho, wo) = _im2col(x_nhwc, stride)        # (M, K) f32
    m, k = patches.shape
    cout = w_oihw.shape[0]

    cp = _round_up(cout, LANE)          # lane-dense output channels
    mp = _round_up(m, M_TILE)
    num_tiles = mp // M_TILE

    # bf16 matmul operands (f32 accumulation in-kernel); zero-pad rows/lanes so
    # padded rows/channels contribute exactly zero to the BN sums.
    patches_b = jnp.pad(patches, ((0, mp - m), (0, 0))).astype(jnp.bfloat16)
    # (Cout, Cin, kh, kw) -> (kh, kw, Cin, Cout) -> (K, Cout), matching patch order
    w_mat = jnp.transpose(w_oihw, (2, 3, 1, 0)).reshape(k, cout)
    w_mat = jnp.pad(w_mat, ((0, 0), (0, cp - cout))).astype(jnp.bfloat16)

    flops = 2 * mp * k * cp
    bytes_accessed = mp * k * 2 + k * cp * 2 + mp * cp * 4 + num_tiles * 8 * cp * 4

    # Pass 1: tiled matmul + per-tile partial BN statistics.
    y, stats = pl.pallas_call(
        _matmul_stats_kernel,
        grid=(num_tiles,),
        out_shape=(jax.ShapeDtypeStruct((mp, cp), jnp.float32),
                   jax.ShapeDtypeStruct((num_tiles * 8, cp), jnp.float32)),
        in_specs=[pl.BlockSpec((M_TILE, k), lambda i: (i, 0)),
                  pl.BlockSpec((k, cp), lambda i: (0, 0))],
        out_specs=(pl.BlockSpec((M_TILE, cp), lambda i: (i, 0)),
                   pl.BlockSpec((8, cp), lambda i: (i, 0))),
        compiler_params=pltpu.CompilerParams(
            dimension_semantics=("parallel",),
            vmem_limit_bytes=VMEM_LIMIT),
        cost_estimate=pl.CostEstimate(flops=flops, transcendentals=0,
                                      bytes_accessed=bytes_accessed),
    )(patches_b, w_mat)

    # Cross-tile BN reduction + fold into per-channel scale/shift (tiny, f32).
    stats = stats.reshape(num_tiles, 8, cp)
    total = jnp.sum(stats[:, 0, :], axis=0)
    total_sq = jnp.sum(stats[:, 1, :], axis=0)
    mean = total / m                       # true M: padded rows contribute 0
    var = total_sq / m - mean * mean       # biased variance (training-mode BN)
    gamma_p = jnp.pad(gamma, (0, cp - cout))
    beta_p = jnp.pad(beta, (0, cp - cout))
    scale = (gamma_p * lax.rsqrt(var + EPS)).reshape(1, cp)
    shift = (beta_p - mean * scale[0]).reshape(1, cp)

    # Pass 2: tiled, lane-dense normalize + affine + ReLU.
    out = pl.pallas_call(
        _affine_relu_kernel,
        grid=(num_tiles,),
        out_shape=jax.ShapeDtypeStruct((mp, cp), jnp.float32),
        in_specs=[pl.BlockSpec((M_TILE, cp), lambda i: (i, 0)),
                  pl.BlockSpec((1, cp), lambda i: (0, 0)),
                  pl.BlockSpec((1, cp), lambda i: (0, 0))],
        out_specs=pl.BlockSpec((M_TILE, cp), lambda i: (i, 0)),
        compiler_params=pltpu.CompilerParams(
            dimension_semantics=("parallel",),
            vmem_limit_bytes=VMEM_LIMIT),
        cost_estimate=pl.CostEstimate(flops=2 * mp * cp, transcendentals=0,
                                      bytes_accessed=2 * mp * cp * 4),
    )(y, scale, shift)

    return out[:m, :cout].reshape(n, ho, wo, cout)


def basic_block_c(x_nchw, params, stride=1):
    x = jnp.transpose(x_nchw, (0, 2, 3, 1))          # NCHW -> NHWC
    out = conv_bn_relu(x, params["w1"], params["g1"], params["b1"], stride=1)
    out = conv_bn_relu(out, params["w2"], params["g2"], params["b2"], stride=stride)
    return jnp.transpose(out, (0, 3, 1, 2))          # NHWC -> NCHW


def _reference_forward(x, params, stride):
    def conv(x, w, s):
        return lax.conv_general_dilated(
            x, w, window_strides=(s, s), padding=((1, 1), (1, 1)),
            dimension_numbers=("NCHW", "OIHW", "NCHW"))

    def bn_relu(y, g, b):
        mean = jnp.mean(y, axis=(0, 2, 3), keepdims=True)
        var = jnp.mean((y - mean) ** 2, axis=(0, 2, 3), keepdims=True)
        y_hat = (y - mean) * lax.rsqrt(var + EPS)
        return jnp.maximum(y_hat * g.reshape(1, -1, 1, 1) + b.reshape(1, -1, 1, 1), 0.0)

    out = bn_relu(conv(x, params["w1"], 1), params["g1"], params["b1"])
    out = bn_relu(conv(out, params["w2"], stride), params["g2"], params["b2"])
    return out


if __name__ == "__main__":
    in_planes, planes, stride = 4, 8, 1
    N, H, W = 2, 16, 16

    key = jax.random.PRNGKey(0)
    kx, kw1, kw2 = jax.random.split(key, 3)
    x = jax.random.normal(kx, (N, in_planes, H, W), dtype=jnp.float32)

    params = {
        # conv weights: deterministic random init (bias=False in the module)
        "w1": jax.random.normal(kw1, (planes, in_planes, 3, 3), jnp.float32) * 0.1,
        "w2": jax.random.normal(kw2, (planes, planes, 3, 3), jnp.float32) * 0.1,
        # BatchNorm2d default init: weight=1, bias=0
        "g1": jnp.ones((planes,), jnp.float32),
        "b1": jnp.zeros((planes,), jnp.float32),
        "g2": jnp.ones((planes,), jnp.float32),
        "b2": jnp.zeros((planes,), jnp.float32),
    }

    fwd = jax.jit(lambda xx, pp: basic_block_c(xx, pp, stride=stride))
    out = jax.block_until_ready(fwd(x, params))
    ref = jax.block_until_ready(_reference_forward(x, params, stride))

    assert out.shape == (N, planes, H, W), out.shape
    # Tolerance accounts for bf16 MXU operands (f32 accumulation / BN math);
    # post-BN outputs are O(1), observed/expected max deviation is ~2-3e-2.
    max_err = float(jnp.max(jnp.abs(out - ref)))
    assert max_err < 5e-2, max_err
    print("KERNEL_OK")
</pallas_src>

<mosaic_0001>
module attributes {stable_mosaic.version = 11 : i64} {
  func.func @_matmul_stats_kernel(%arg0: i32, %arg1: memref<256x36xbf16, #tpu.memory_space<vmem>>, %arg2: memref<36x128xbf16, #tpu.memory_space<vmem>>, %arg3: memref<256x128xf32, #tpu.memory_space<vmem>>, %arg4: memref<8x128xf32, #tpu.memory_space<vmem>>) attributes {dimension_semantics = [#tpu.dimension_semantics<parallel>], iteration_bounds = array<i64: 2>, scalar_prefetch = 0 : i64, scratch_operands = 0 : i64, tpu.core_type = #tpu.core_type<tc>, window_params = [{transform_indices = @transform_0, window_bounds = array<i64: 256, 36>}, {pipeline_mode = #tpu.pipeline_mode<synchronous>, transform_indices = @transform_1, window_bounds = array<i64: 36, 128>}, {transform_indices = @transform_2, window_bounds = array<i64: 256, 128>}, {transform_indices = @transform_3, window_bounds = array<i64: 8, 128>}]} {
    %c0 = arith.constant 0 : index
    %c0_0 = arith.constant 0 : index
    %0 = vector.load %arg1[%c0, %c0_0] : memref<256x36xbf16, #tpu.memory_space<vmem>>, vector<256x36xbf16>
    %c0_1 = arith.constant 0 : index
    %c0_2 = arith.constant 0 : index
    %1 = vector.load %arg2[%c0_1, %c0_2] : memref<36x128xbf16, #tpu.memory_space<vmem>>, vector<36x128xbf16>
    %cst = arith.constant dense<0.000000e+00> : vector<256x128xf32>
    %2 = tpu.matmul %0, %1, %cst {dimension_numbers = #tpu.dot_dimension_numbers<[1], [0], [0], [1], [0, 0, 1, 1], [], []>} : vector<256x36xbf16>, vector<36x128xbf16>, vector<256x128xf32> -> vector<256x128xf32>
    %c0_3 = arith.constant 0 : index
    %c0_4 = arith.constant 0 : index
    %3 = vector.load %arg3[%c0_3, %c0_4] : memref<256x128xf32, #tpu.memory_space<vmem>>, vector<256x128xf32>
    tpu.vector_store %arg3[%c0_3, %c0_4], %2 {strides = array<i32>} : memref<256x128xf32, #tpu.memory_space<vmem>>, vector<256x128xf32>,
    %cst_5 = arith.constant dense<0.000000e+00> : vector<128xf32>
    %4 = vector.multi_reduction <add>, %2, %cst_5 [0] : vector<256x128xf32> to vector<128xf32>
    %5 = vector.shape_cast %4 : vector<128xf32> to vector<1x128xf32>
    %6 = arith.mulf %2, %2 : vector<256x128xf32>
    %cst_6 = arith.constant dense<0.000000e+00> : vector<128xf32>
    %7 = vector.multi_reduction <add>, %6, %cst_6 [0] : vector<256x128xf32> to vector<128xf32>
    %8 = vector.shape_cast %7 : vector<128xf32> to vector<1x128xf32>
    %9 = tpu.iota {dimensions = array<i32: 0>} : vector<8x1xi32>
    %c0_i32 = arith.constant 0 : i32
    %10 = vector.broadcast %c0_i32 : i32 to vector<8x1xi32>
    %11 = arith.cmpi eq, %9, %10 : vector<8x1xi32>
    %c1_i32 = arith.constant 1 : i32
    %12 = vector.broadcast %c1_i32 : i32 to vector<8x1xi32>
    %13 = arith.cmpi eq, %9, %12 : vector<8x1xi32>
    %cst_7 = arith.constant 0.000000e+00 : f32
    %14 = vector.shape_cast %13 : vector<8x1xi1> to vector<8x1xi1>
    %15 = vector.broadcast %14 : vector<8x1xi1> to vector<8x128xi1>
    %16 = vector.shape_cast %8 : vector<1x128xf32> to vector<1x128xf32>
    %17 = vector.broadcast %16 : vector<1x128xf32> to vector<8x128xf32>
    %18 = vector.broadcast %cst_7 : f32 to vector<8x128xf32>
    %19 = arith.select %15, %17, %18 : vector<8x128xi1>, vector<8x128xf32>
    %20 = vector.shape_cast %11 : vector<8x1xi1> to vector<8x1xi1>
    %21 = vector.broadcast %20 : vector<8x1xi1> to vector<8x128xi1>
    %22 = vector.shape_cast %5 : vector<1x128xf32> to vector<1x128xf32>
    %23 = vector.broadcast %22 : vector<1x128xf32> to vector<8x128xf32>
    %24 = arith.select %21, %23, %19 : vector<8x128xi1>, vector<8x128xf32>
    %c0_8 = arith.constant 0 : index
    %c0_9 = arith.constant 0 : index
    %25 = vector.load %arg4[%c0_8, %c0_9] : memref<8x128xf32, #tpu.memory_space<vmem>>, vector<8x128xf32>
    tpu.vector_store %arg4[%c0_8, %c0_9], %24 {strides = array<i32>} : memref<8x128xf32, #tpu.memory_space<vmem>>, vector<8x128xf32>,
    return
  }
  func.func @transform_0(%arg0: i32) -> (i32, i32) {
    %c0_i32 = arith.constant 0 : i32
    %c0_i32_0 = arith.constant 0 : i32
    return %arg0, %c0_i32 : i32, i32
  }
  func.func @transform_1(%arg0: i32) -> (i32, i32) {
    %c0_i32 = arith.constant 0 : i32
    %c0_i32_0 = arith.constant 0 : i32
    %c0_i32_1 = arith.constant 0 : i32
    return %c0_i32, %c0_i32_0 : i32, i32
  }
  func.func @transform_2(%arg0: i32) -> (i32, i32) {
    %c0_i32 = arith.constant 0 : i32
    %c0_i32_0 = arith.constant 0 : i32
    return %arg0, %c0_i32 : i32, i32
  }
  func.func @transform_3(%arg0: i32) -> (i32, i32) {
    %c0_i32 = arith.constant 0 : i32
    %c0_i32_0 = arith.constant 0 : i32
    return %arg0, %c0_i32 : i32, i32
  }
}

module attributes {stable_mosaic.version = 11 : i64} {
  func.func @_affine_relu_kernel(%arg0: i32, %arg1: memref<256x128xf32, #tpu.memory_space<vmem>>, %arg2: memref<1x128xf32, #tpu.memory_space<vmem>>, %arg3: memref<1x128xf32, #tpu.memory_space<vmem>>, %arg4: memref<256x128xf32, #tpu.memory_space<vmem>>) attributes {dimension_semantics = [#tpu.dimension_semantics<parallel>], iteration_bounds = array<i64: 2>, scalar_prefetch = 0 : i64, scratch_operands = 0 : i64, tpu.core_type = #tpu.core_type<tc>, window_params = [{transform_indices = @transform_0, window_bounds = array<i64: 256, 128>}, {pipeline_mode = #tpu.pipeline_mode<synchronous>, transform_indices = @transform_1, window_bounds = array<i64: 1, 128>}, {pipeline_mode = #tpu.pipeline_mode<synchronous>, transform_indices = @transform_2, window_bounds = array<i64: 1, 128>}, {transform_indices = @transform_3, window_bounds = array<i64: 256, 128>}]} {
    %c0 = arith.constant 0 : index
    %c0_0 = arith.constant 0 : index
    %0 = vector.load %arg1[%c0, %c0_0] : memref<256x128xf32, #tpu.memory_space<vmem>>, vector<256x128xf32>
    %c0_1 = arith.constant 0 : index
    %c0_2 = arith.constant 0 : index
    %1 = vector.load %arg2[%c0_1, %c0_2] : memref<1x128xf32, #tpu.memory_space<vmem>>, vector<1x128xf32>
    %2 = vector.broadcast %1 : vector<1x128xf32> to vector<256x128xf32>
    %3 = arith.mulf %0, %2 : vector<256x128xf32>
    %c0_3 = arith.constant 0 : index
    %c0_4 = arith.constant 0 : index
    %4 = vector.load %arg3[%c0_3, %c0_4] : memref<1x128xf32, #tpu.memory_space<vmem>>, vector<1x128xf32>
    %5 = vector.broadcast %4 : vector<1x128xf32> to vector<256x128xf32>
    %6 = arith.addf %3, %5 : vector<256x128xf32>
    %cst = arith.constant 0.000000e+00 : f32
    %7 = vector.broadcast %cst : f32 to vector<256x128xf32>
    %8 = arith.maximumf %6, %7 : vector<256x128xf32>
    %c0_5 = arith.constant 0 : index
    %c0_6 = arith.constant 0 : index
    %9 = vector.load %arg4[%c0_5, %c0_6] : memref<256x128xf32, #tpu.memory_space<vmem>>, vector<256x128xf32>
    tpu.vector_store %arg4[%c0_5, %c0_6], %8 {strides = array<i32>} : memref<256x128xf32, #tpu.memory_space<vmem>>, vector<256x128xf32>,
    return
  }
  func.func @transform_0(%arg0: i32) -> (i32, i32) {
    %c0_i32 = arith.constant 0 : i32
    %c0_i32_0 = arith.constant 0 : i32
    return %arg0, %c0_i32 : i32, i32
  }
  func.func @transform_1(%arg0: i32) -> (i32, i32) {
    %c0_i32 = arith.constant 0 : i32
    %c0_i32_0 = arith.constant 0 : i32
    %c0_i32_1 = arith.constant 0 : i32
    return %c0_i32, %c0_i32_0 : i32, i32
  }
  func.func @transform_2(%arg0: i32) -> (i32, i32) {
    %c0_i32 = arith.constant 0 : i32
    %c0_i32_0 = arith.constant 0 : i32
    %c0_i32_1 = arith.constant 0 : i32
    return %c0_i32, %c0_i32_0 : i32, i32
  }
  func.func @transform_3(%arg0: i32) -> (i32, i32) {
    %c0_i32 = arith.constant 0 : i32
    %c0_i32_0 = arith.constant 0 : i32
    return %arg0, %c0_i32 : i32, i32
  }
}

module attributes {stable_mosaic.version = 11 : i64} {
  func.func @_matmul_stats_kernel(%arg0: i32, %arg1: memref<256x72xbf16, #tpu.memory_space<vmem>>, %arg2: memref<72x128xbf16, #tpu.memory_space<vmem>>, %arg3: memref<256x128xf32, #tpu.memory_space<vmem>>, %arg4: memref<8x128xf32, #tpu.memory_space<vmem>>) attributes {dimension_semantics = [#tpu.dimension_semantics<parallel>], iteration_bounds = array<i64: 2>, scalar_prefetch = 0 : i64, scratch_operands = 0 : i64, tpu.core_type = #tpu.core_type<tc>, window_params = [{transform_indices = @transform_0, window_bounds = array<i64: 256, 72>}, {pipeline_mode = #tpu.pipeline_mode<synchronous>, transform_indices = @transform_1, window_bounds = array<i64: 72, 128>}, {transform_indices = @transform_2, window_bounds = array<i64: 256, 128>}, {transform_indices = @transform_3, window_bounds = array<i64: 8, 128>}]} {
    %c0 = arith.constant 0 : index
    %c0_0 = arith.constant 0 : index
    %0 = vector.load %arg1[%c0, %c0_0] : memref<256x72xbf16, #tpu.memory_space<vmem>>, vector<256x72xbf16>
    %c0_1 = arith.constant 0 : index
    %c0_2 = arith.constant 0 : index
    %1 = vector.load %arg2[%c0_1, %c0_2] : memref<72x128xbf16, #tpu.memory_space<vmem>>, vector<72x128xbf16>
    %cst = arith.constant dense<0.000000e+00> : vector<256x128xf32>
    %2 = tpu.matmul %0, %1, %cst {dimension_numbers = #tpu.dot_dimension_numbers<[1], [0], [0], [1], [0, 0, 1, 1], [], []>} : vector<256x72xbf16>, vector<72x128xbf16>, vector<256x128xf32> -> vector<256x128xf32>
    %c0_3 = arith.constant 0 : index
    %c0_4 = arith.constant 0 : index
    %3 = vector.load %arg3[%c0_3, %c0_4] : memref<256x128xf32, #tpu.memory_space<vmem>>, vector<256x128xf32>
    tpu.vector_store %arg3[%c0_3, %c0_4], %2 {strides = array<i32>} : memref<256x128xf32, #tpu.memory_space<vmem>>, vector<256x128xf32>,
    %cst_5 = arith.constant dense<0.000000e+00> : vector<128xf32>
    %4 = vector.multi_reduction <add>, %2, %cst_5 [0] : vector<256x128xf32> to vector<128xf32>
    %5 = vector.shape_cast %4 : vector<128xf32> to vector<1x128xf32>
    %6 = arith.mulf %2, %2 : vector<256x128xf32>
    %cst_6 = arith.constant dense<0.000000e+00> : vector<128xf32>
    %7 = vector.multi_reduction <add>, %6, %cst_6 [0] : vector<256x128xf32> to vector<128xf32>
    %8 = vector.shape_cast %7 : vector<128xf32> to vector<1x128xf32>
    %9 = tpu.iota {dimensions = array<i32: 0>} : vector<8x1xi32>
    %c0_i32 = arith.constant 0 : i32
    %10 = vector.broadcast %c0_i32 : i32 to vector<8x1xi32>
    %11 = arith.cmpi eq, %9, %10 : vector<8x1xi32>
    %c1_i32 = arith.constant 1 : i32
    %12 = vector.broadcast %c1_i32 : i32 to vector<8x1xi32>
    %13 = arith.cmpi eq, %9, %12 : vector<8x1xi32>
    %cst_7 = arith.constant 0.000000e+00 : f32
    %14 = vector.shape_cast %13 : vector<8x1xi1> to vector<8x1xi1>
    %15 = vector.broadcast %14 : vector<8x1xi1> to vector<8x128xi1>
    %16 = vector.shape_cast %8 : vector<1x128xf32> to vector<1x128xf32>
    %17 = vector.broadcast %16 : vector<1x128xf32> to vector<8x128xf32>
    %18 = vector.broadcast %cst_7 : f32 to vector<8x128xf32>
    %19 = arith.select %15, %17, %18 : vector<8x128xi1>, vector<8x128xf32>
    %20 = vector.shape_cast %11 : vector<8x1xi1> to vector<8x1xi1>
    %21 = vector.broadcast %20 : vector<8x1xi1> to vector<8x128xi1>
    %22 = vector.shape_cast %5 : vector<1x128xf32> to vector<1x128xf32>
    %23 = vector.broadcast %22 : vector<1x128xf32> to vector<8x128xf32>
    %24 = arith.select %21, %23, %19 : vector<8x128xi1>, vector<8x128xf32>
    %c0_8 = arith.constant 0 : index
    %c0_9 = arith.constant 0 : index
    %25 = vector.load %arg4[%c0_8, %c0_9] : memref<8x128xf32, #tpu.memory_space<vmem>>, vector<8x128xf32>
    tpu.vector_store %arg4[%c0_8, %c0_9], %24 {strides = array<i32>} : memref<8x128xf32, #tpu.memory_space<vmem>>, vector<8x128xf32>,
    return
  }
  func.func @transform_0(%arg0: i32) -> (i32, i32) {
    %c0_i32 = arith.constant 0 : i32
    %c0_i32_0 = arith.constant 0 : i32
    return %arg0, %c0_i32 : i32, i32
  }
  func.func @transform_1(%arg0: i32) -> (i32, i32) {
    %c0_i32 = arith.constant 0 : i32
    %c0_i32_0 = arith.constant 0 : i32
    %c0_i32_1 = arith.constant 0 : i32
    return %c0_i32, %c0_i32_0 : i32, i32
  }
  func.func @transform_2(%arg0: i32) -> (i32, i32) {
    %c0_i32 = arith.constant 0 : i32
    %c0_i32_0 = arith.constant 0 : i32
    return %arg0, %c0_i32 : i32, i32
  }
  func.func @transform_3(%arg0: i32) -> (i32, i32) {
    %c0_i32 = arith.constant 0 : i32
    %c0_i32_0 = arith.constant 0 : i32
    return %arg0, %c0_i32 : i32, i32
  }
}

</mosaic_0001>

<bundles_post_ra>
// kernel: _lambda_.5
= control target key start
LH: loop header
LB: loop body
LE: loop exit
PB: predicated region body
PF: predicated region fallthrough
CT: control target
= control target key end

     0   :  { %s453_s12 = smov 0   ;;  %s612_s0 = inlined_call_operand.vmem [shape: f32[512,128], index: 0, kind: input, shape index: {}]   ;;  %s613_s1 = inlined_call_operand.vmem [shape: f32[1,128], index: 1, kind: input, shape index: {}]   ;;  %s614_s2 = inlined_call_operand.vmem [shape: f32[1,128], index: 2, kind: input, shape index: {}]   ;;  %s615_s3 = inlined_call_operand.vmem [shape: f32[512,128], index: 3, kind: output, shape index: {}]  }
   0x1 LB: > { %s404_s13 = sadd.s32 4294967295, %s431_s12   ;;  %p408_p0 = scmp.ge.s32.totalorder %s431_s12, 1  ;;  %s431_s12 = sphi %s453_s12, %s13_s12  }
   0x2   : > { %p138_p1 = scmp.lt.s32.totalorder %s431_s12, 3 }
   0x4   : > { %p139_p2 = pnand %p408_p0, %p138_p1 }
   0x5   : > { %s409_s14 = sshll.u32 (!%p139_p2), %s404_s13, 5 }
   0x6   : > { %142 = sbr.rel (%p139_p2) target bundleno = 44 (0x2c), region = 32  ;;  %p163_p3 = scmp.lt.s32.totalorder (!%p139_p2), %s409_s14, 63 }
   0xb   : > { %s617_s14 = smov (!%p163_p3, %s409_s14), 63  ;;  %v464_v0 = vld [vmem:[%s613_s1] ss:$0 sm:$0xff] }
   0xc   : > { %s410_s15 = sshll.u32 %s617_s14, 3  ;;  %v474_v1 = vld [vmem:[%s614_s2] ss:$0 sm:$0xff] }
   0xd   : > { %s469_s20 = scalar_lea.vmem %s612_s0, %s410_s15  ;;  %s497_s25 = scalar_lea.vmem %s615_s3, %s410_s15 }
   0xe   : > { %v174_v2 = vld [vmem:[%s469_s20] sm:$0xff]  ;;  %v175_v3 = vld [vmem:[%s469_s20 + $0x8] sm:$0xff]  ;;  %v176_v4 = vld [vmem:[%s469_s20 + $0x10] sm:$0xff] }
   0xf   : > { %v213_v5 = vmul.f32 %v464_v0, %v174_v2  ;;  %v214_v6 = vmul.f32 %v464_v0, %v175_v3  ;;  %v215_v7 = vmul.f32 %v464_v0, %v176_v4  ;;  %v177_v8 = vld [vmem:[%s469_s20 + $0x18] sm:$0xff]  ;;  %v178_v9 = vld [vmem:[%s469_s20 + $0x20] sm:$0xff]  ;;  %v179_v10 = vld [vmem:[%s469_s20 + $0x28] sm:$0xff] }
  0x10   : > { %v216_v11 = vmul.f32 %v464_v0, %v177_v8  ;;  %v217_v12 = vmul.f32 %v464_v0, %v178_v9  ;;  %v218_v13 = vmul.f32 %v464_v0, %v179_v10  ;;  %v180_v14 = vld [vmem:[%s469_s20 + $0x30] sm:$0xff]  ;;  %v181_v15 = vld [vmem:[%s469_s20 + $0x38] sm:$0xff]  ;;  %v182_v24 = vld [vmem:[%s469_s20 + $0x40] sm:$0xff] }
  0x11   : > { %v252_v16 = vadd.f32 %v474_v1, %v213_v5  ;;  %v253_v17 = vadd.f32 %v474_v1, %v214_v6  ;;  %v254_v18 = vadd.f32 %v474_v1, %v215_v7  ;;  %v219_v19 = vmul.f32 %v464_v0, %v180_v14  ;;  %v183_v25 = vld [vmem:[%s469_s20 + $0x48] sm:$0xff]  ;;  %v184_v26 = vld [vmem:[%s469_s20 + $0x50] sm:$0xff]  ;;  %v185_v31 = vld [vmem:[%s469_s20 + $0x58] sm:$0xff] }
  0x12   : > { %v255_v20 = vadd.f32 %v474_v1, %v216_v11  ;;  %v256_v21 = vadd.f32 %v474_v1, %v217_v12  ;;  %v257_v22 = vadd.f32 %v474_v1, %v218_v13  ;;  %v220_v23 = vmul.f32 %v464_v0, %v181_v15  ;;  %v186_v32 = vld [vmem:[%s469_s20 + $0x60] sm:$0xff]  ;;  %v187_v33 = vld [vmem:[%s469_s20 + $0x68] sm:$0xff]  ;;  %v188_v38 = vld [vmem:[%s469_s20 + $0x70] sm:$0xff] }
  0x13   : > { %v284_v27 = vmax.f32 %v252_v16, 0.0  ;;  %v285_v28 = vmax.f32 %v253_v17, 0.0  ;;  %v286_v29 = vmax.f32 %v254_v18, 0.0  ;;  %v258_v30 = vadd.f32 %v474_v1, %v219_v19  ;;  %v189_v43 = vld [vmem:[%s469_s20 + $0x78] sm:$0xff]  ;;  %v190_v56 = vld [vmem:[%s469_s20 + $0x80] sm:$0xff]  ;;  %v191_v57 = vld [vmem:[%s469_s20 + $0x88] sm:$0xff] }
  0x14   : > { %v287_v34 = vmax.f32 %v255_v20, 0.0  ;;  %v288_v35 = vmax.f32 %v256_v21, 0.0  ;;  %v289_v36 = vmax.f32 %v257_v22, 0.0  ;;  %v259_v37 = vadd.f32 %v474_v1, %v220_v23  ;;  %v192_v58 = vld [vmem:[%s469_s20 + $0x90] sm:$0xff]  ;;  %v193_v63 = vld [vmem:[%s469_s20 + $0x98] sm:$0xff]  ;;  %v194_v2 = vld [vmem:[%s469_s20 + $0xa0] sm:$0xff] }
  0x15   : > { %316 = vst [vmem:[%s497_s25] sm:$0xff] %v284_v27  ;;  %317 = vst [vmem:[%s497_s25 + $0x8] sm:$0xff] %v285_v28  ;;  %v290_v39 = vmax.f32 %v258_v30, 0.0  ;;  %v221_v40 = vmul.f32 %v464_v0, %v182_v24  ;;  %v222_v41 = vmul.f32 %v464_v0, %v183_v25  ;;  %v223_v42 = vmul.f32 %v464_v0, %v184_v26  ;;  %v195_v3 = vld [vmem:[%s469_s20 + $0xa8] sm:$0xff]  ;;  %v196_v8 = vld [vmem:[%s469_s20 + $0xb0] sm:$0xff] }
  0x16   : > { %318 = vst [vmem:[%s497_s25 + $0x10] sm:$0xff] %v286_v29  ;;  %319 = vst [vmem:[%s497_s25 + $0x18] sm:$0xff] %v287_v34  ;;  %v291_v44 = vmax.f32 %v259_v37, 0.0  ;;  %v224_v45 = vmul.f32 %v464_v0, %v185_v31  ;;  %v225_v46 = vmul.f32 %v464_v0, %v186_v32  ;;  %v226_v47 = vmul.f32 %v464_v0, %v187_v33  ;;  %v197_v13 = vld [vmem:[%s469_s20 + $0xb8] sm:$0xff]  ;;  %v198_v26 = vld [vmem:[%s469_s20 + $0xc0] sm:$0xff] }
  0x17   : > { %320 = vst [vmem:[%s497_s25 + $0x20] sm:$0xff] %v288_v35  ;;  %321 = vst [vmem:[%s497_s25 + $0x28] sm:$0xff] %v289_v36  ;;  %v260_v48 = vadd.f32 %v474_v1, %v221_v40  ;;  %v261_v49 = vadd.f32 %v474_v1, %v222_v41  ;;  %v262_v50 = vadd.f32 %v474_v1, %v223_v42  ;;  %v199_v27 = vld [vmem:[%s469_s20 + $0xc8] sm:$0xff]  ;;  %v200_v28 = vld [vmem:[%s469_s20 + $0xd0] sm:$0xff] }
  0x18   : > { %322 = vst [vmem:[%s497_s25 + $0x30] sm:$0xff] %v290_v39  ;;  %v227_v51 = vmul.f32 %v464_v0, %v188_v38  ;;  %323 = vst [vmem:[%s497_s25 + $0x38] sm:$0xff] %v291_v44  ;;  %v263_v52 = vadd.f32 %v474_v1, %v224_v45  ;;  %v264_v53 = vadd.f32 %v474_v1, %v225_v46  ;;  %v201_v33 = vld [vmem:[%s469_s20 + $0xd8] sm:$0xff]  ;;  %v202_v34 = vld [vmem:[%s469_s20 + $0xe0] sm:$0xff] }
  0x19   : > { %v265_v54 = vadd.f32 %v474_v1, %v226_v47  ;;  %v228_v55 = vmul.f32 %v464_v0, %v189_v43  ;;  %v292_v59 = vmax.f32 %v260_v48, 0.0  ;;  %v293_v60 = vmax.f32 %v261_v49, 0.0  ;;  %v203_v35 = vld [vmem:[%s469_s20 + $0xe8] sm:$0xff]  ;;  %v204_v40 = vld [vmem:[%s469_s20 + $0xf0] sm:$0xff]  ;;  %v205_v45 = vld [vmem:[%s469_s20 + $0xf8] sm:$0xff] }
  0x1a   : > { %v294_v61 = vmax.f32 %v262_v50, 0.0  ;;  %v266_v62 = vadd.f32 %v474_v1, %v227_v51  ;;  %v295_v4 = vmax.f32 %v263_v52, 0.0  ;;  %v296_v5 = vmax.f32 %v264_v53, 0.0 }
  0x1b   : > { %v297_v6 = vmax.f32 %v265_v54, 0.0  ;;  %v267_v7 = vadd.f32 %v474_v1, %v228_v55  ;;  %324 = vst [vmem:[%s497_s25 + $0x40] sm:$0xff] %v292_v59  ;;  %325 = vst [vmem:[%s497_s25 + $0x48] sm:$0xff] %v293_v60  ;;  %v229_v10 = vmul.f32 %v464_v0, %v190_v56  ;;  %v230_v11 = vmul.f32 %v464_v0, %v191_v57 }
  0x1c   : > { %326 = vst [vmem:[%s497_s25 + $0x50] sm:$0xff] %v294_v61  ;;  %v298_v9 = vmax.f32 %v266_v62, 0.0  ;;  %v231_v12 = vmul.f32 %v464_v0, %v192_v58  ;;  %327 = vst [vmem:[%s497_s25 + $0x58] sm:$0xff] %v295_v4  ;;  %v232_v15 = vmul.f32 %v464_v0, %v193_v63  ;;  %v233_v16 = vmul.f32 %v464_v0, %v194_v2 }
  0x1d   : > { %328 = vst [vmem:[%s497_s25 + $0x60] sm:$0xff] %v296_v5  ;;  %329 = vst [vmem:[%s497_s25 + $0x68] sm:$0xff] %v297_v6  ;;  %v299_v14 = vmax.f32 %v267_v7, 0.0  ;;  %v234_v17 = vmul.f32 %v464_v0, %v195_v3  ;;  %v268_v18 = vadd.f32 %v474_v1, %v229_v10  ;;  %v269_v19 = vadd.f32 %v474_v1, %v230_v11 }
  0x1e   : > { %330 = vst [vmem:[%s497_s25 + $0x70] sm:$0xff] %v298_v9  ;;  %v270_v20 = vadd.f32 %v474_v1, %v231_v12  ;;  %v235_v21 = vmul.f32 %v464_v0, %v196_v8  ;;  %v271_v22 = vadd.f32 %v474_v1, %v232_v15  ;;  %v272_v23 = vadd.f32 %v474_v1, %v233_v16 }
  0x1f   : > { %331 = vst [vmem:[%s497_s25 + $0x78] sm:$0xff] %v299_v14  ;;  %v273_v24 = vadd.f32 %v474_v1, %v234_v17  ;;  %v236_v25 = vmul.f32 %v464_v0, %v197_v13  ;;  %v300_v29 = vmax.f32 %v268_v18, 0.0  ;;  %v301_v30 = vmax.f32 %v269_v19, 0.0 }
  0x20   : > { %v302_v31 = vmax.f32 %v270_v20, 0.0  ;;  %v274_v32 = vadd.f32 %v474_v1, %v235_v21  ;;  %v303_v36 = vmax.f32 %v271_v22, 0.0  ;;  %v304_v37 = vmax.f32 %v272_v23, 0.0 }
  0x21   : > { %v305_v38 = vmax.f32 %v273_v24, 0.0  ;;  %v275_v39 = vadd.f32 %v474_v1, %v236_v25  ;;  %332 = vst [vmem:[%s497_s25 + $0x80] sm:$0xff] %v300_v29  ;;  %333 = vst [vmem:[%s497_s25 + $0x88] sm:$0xff] %v301_v30  ;;  %v237_v42 = vmul.f32 %v464_v0, %v198_v26  ;;  %v238_v43 = vmul.f32 %v464_v0, %v199_v27 }
  0x22   : > { %334 = vst [vmem:[%s497_s25 + $0x90] sm:$0xff] %v302_v31  ;;  %v306_v41 = vmax.f32 %v274_v32, 0.0  ;;  %v239_v44 = vmul.f32 %v464_v0, %v200_v28  ;;  %335 = vst [vmem:[%s497_s25 + $0x98] sm:$0xff] %v303_v36  ;;  %v240_v47 = vmul.f32 %v464_v0, %v201_v33  ;;  %v241_v48 = vmul.f32 %v464_v0, %v202_v34 }
  0x23   : > { %336 = vst [vmem:[%s497_s25 + $0xa0] sm:$0xff] %v304_v37  ;;  %337 = vst [vmem:[%s497_s25 + $0xa8] sm:$0xff] %v305_v38  ;;  %v307_v46 = vmax.f32 %v275_v39, 0.0  ;;  %v242_v49 = vmul.f32 %v464_v0, %v203_v35  ;;  %v276_v50 = vadd.f32 %v474_v1, %v237_v42  ;;  %v277_v51 = vadd.f32 %v474_v1, %v238_v43 }
  0x24   : > { %338 = vst [vmem:[%s497_s25 + $0xb0] sm:$0xff] %v306_v41  ;;  %v278_v52 = vadd.f32 %v474_v1, %v239_v44  ;;  %v243_v53 = vmul.f32 %v464_v0, %v204_v40  ;;  %v279_v54 = vadd.f32 %v474_v1, %v240_v47  ;;  %v280_v55 = vadd.f32 %v474_v1, %v241_v48 }
  0x25   : > { %339 = vst [vmem:[%s497_s25 + $0xb8] sm:$0xff] %v307_v46  ;;  %v281_v56 = vadd.f32 %v474_v1, %v242_v49  ;;  %v244_v57 = vmul.f32 %v464_v0, %v205_v45  ;;  %v308_v58 = vmax.f32 %v276_v50, 0.0  ;;  %v309_v59 = vmax.f32 %v277_v51, 0.0 }
  0x26   : > { %v310_v60 = vmax.f32 %v278_v52, 0.0  ;;  %v282_v61 = vadd.f32 %v474_v1, %v243_v53  ;;  %v311_v62 = vmax.f32 %v279_v54, 0.0  ;;  %v312_v63 = vmax.f32 %v280_v55, 0.0 }
  0x27   : > { %v313_v2 = vmax.f32 %v281_v56, 0.0  ;;  %v283_v3 = vadd.f32 %v474_v1, %v244_v57  ;;  %340 = vst [vmem:[%s497_s25 + $0xc0] sm:$0xff] %v308_v58  ;;  %341 = vst [vmem:[%s497_s25 + $0xc8] sm:$0xff] %v309_v59 }
  0x28   : > { %342 = vst [vmem:[%s497_s25 + $0xd0] sm:$0xff] %v310_v60  ;;  %v314_v4 = vmax.f32 %v282_v61, 0.0  ;;  %343 = vst [vmem:[%s497_s25 + $0xd8] sm:$0xff] %v311_v62 }
  0x29   : > { %344 = vst [vmem:[%s497_s25 + $0xe0] sm:$0xff] %v312_v63  ;;  %345 = vst [vmem:[%s497_s25 + $0xe8] sm:$0xff] %v313_v2  ;;  %v315_v0 = vmax.f32 %v283_v3, 0.0 }
  0x2a   : > { %346 = vst [vmem:[%s497_s25 + $0xf0] sm:$0xff] %v314_v4 }
  0x2b   : > { %347 = vst [vmem:[%s497_s25 + $0xf8] sm:$0xff] %v315_v0 }
  0x2c PF: > { %s13_s12 = sadd.s32 1, %s431_s12  }
  0x2d   : > { %p10_p4 = scmp.ge.s32.totalorder %s13_s12, 4  }
  0x2f   :  { %12 = sbr.rel (!%p10_p4) target bundleno = 1 (0x1), region = 62 }

// kernel: _lambda_.4
= control target key start
LH: loop header
LB: loop body
LE: loop exit
PB: predicated region body
PF: predicated region fallthrough
CT: control target
= control target key end

     0   :  { %s935_s12 = smov 0   ;;  %s1107_s0 = inlined_call_operand.vmem [shape: bf16[512,36], index: 0, kind: input, shape index: {}]   ;;  %s1108_s1 = inlined_call_operand.vmem [shape: bf16[36,128], index: 1, kind: input, shape index: {}]   ;;  %s1109_s2 = inlined_call_operand.vmem [shape: f32[512,128], index: 2, kind: output, shape index: {0}]   ;;  %s1110_s3 = inlined_call_operand.vmem [shape: f32[16,128], index: 3, kind: output, shape index: {1}]  }
   0x1 LB: > { %s941_s13 = sadd.s32 4294967295, %s913_s12   ;;  %p772_p0 = scmp.ge.s32.totalorder %s913_s12, 1  ;;  %s913_s12 = sphi %s935_s12, %s14_s12  }
   0x2   : > { %p141_p1 = scmp.lt.s32.totalorder %s913_s12, 3 }
   0x4   : > { %p142_p2 = pnand %p772_p0, %p141_p1 }
   0x5   : > { %s773_s18 = sshll.u32 (!%p142_p2), %s941_s13, 5  ;;  %p181_p4 = scmp.lt.s32.totalorder (!%p142_p2), %s941_s13, 1 }
   0x6   : > { %145 = sbr.rel (%p142_p2) target bundleno = 302 (0x12e), region = 28  ;;  %p170_p3 = scmp.lt.s32.totalorder (!%p142_p2), %s773_s18, 63 }
   0xb   : > { %v888_v0 = vld [vmem:[%s1108_s1 + $0x10] ss:$0 sps:$4 sm:$0x33]   ;;  %vm367_vm0 = vcmask 1041408   ;;  %v889_v1 = vld [vmem:[%s1108_s1 + $0x8] sm:$0xff]   ;;  %v890_v3 = vld [vmem:[%s1108_s1] sm:$0xff]  }
   0xc   : > { %878 = vmatprep.subr.msk.bf16.mxu0 %vm367_vm0, %v888_v0  ;;  %v369_v2 = vsel %vm367_vm0, %v888_v0, 0  ;;  %879 = vmatprep.subr.msk.bf16.mxu1 %vm367_vm0, %v888_v0  ;;  %s1112_s18 = smov (!%p170_p3, %s773_s18), 63  ;;  %vm318_vm1 = vcmask 293888   ;;  %s1114_s13 = smov (!%p181_p4, %s941_s13), 1 }
   0xd   : > { %835 = vmatpush3.bf16.msra.mxu0 %v369_v2  ;;  %875 = vmatpush3.bf16.msra.mxu1 %v369_v2  ;;  %s774_s21 = sshll.u32 %s1112_s18, 2  ;;  %s776_s25 = sshll.u32 %s1112_s18, 3 }
   0xe   : > { %836 = vmatprep.subr.bf16.mxu0 %v889_v1  ;;  %873 = vmatprep.subr.bf16.mxu1 %v889_v1  ;;  %s961_s24 = scalar_lea.vmem %s1107_s0, %s774_s21  ;;  %s999_s28 = scalar_lea.vmem %s1109_s2, %s776_s25 }
   0xf   : > { %v891_v4 = vld [vmem:[%s961_s24] sm:$0xff]   ;;  %v892_v5 = vld [vmem:[%s961_s24 + $0x8] sm:$0xff]   ;;  %v893_v6 = vld [vmem:[%s961_s24 + $0x10] sm:$0xff]   ;;  %s777_s29 = sshll.u32 %s1114_s13, 3 }
  0x10   : > { %840 = vmatprep.mubr.msk.bf16.mxu0 %vm318_vm1, %v891_v4  ;;  %v894_v7 = vld [vmem:[%s961_s24 + $0x18] sm:$0xff]   ;;  %v895_v8 = vld [vmem:[%s961_s24 + $0x20] sm:$0xff]   ;;  %v900_v10 = vld [vmem:[%s961_s24 + $0x48] sm:$0xff]   ;;  %s184_s5 = scalar_lea.vmem %s1110_s3, %s777_s29 }
  0x11   : > { %837 = vmatpush3.bf16.msra.mxu0 %v889_v1  ;;  %876 = vmatpush3.bf16.msra.mxu1 %v889_v1  ;;  %v899_v9 = vld [vmem:[%s961_s24 + $0x40] sm:$0xff]   ;;  %v901_v11 = vld [vmem:[%s961_s24 + $0x50] sm:$0xff]   ;;  %v902_v12 = vld [vmem:[%s961_s24 + $0x58] sm:$0xff]  }
  0x12   : > { %838 = vmatprep.subr.bf16.mxu0 %v890_v3  ;;  %874 = vmatprep.subr.bf16.mxu1 %v890_v3  ;;  %v903_v13 = vld [vmem:[%s961_s24 + $0x60] sm:$0xff]   ;;  %v896_v14 = vld [vmem:[%s961_s24 + $0x28] sm:$0xff]   ;;  %v897_v15 = vld [vmem:[%s961_s24 + $0x30] sm:$0xff]  }
  0x13   : > { %856 = vmatprep.mubr.msk.bf16.mxu1 %vm318_vm1, %v899_v9  ;;  %v904_v16 = vld [vmem:[%s961_s24 + $0x68] sm:$0xff]   ;;  %v905_v17 = vld [vmem:[%s961_s24 + $0x70] sm:$0xff]   ;;  %v898_v18 = vld [vmem:[%s961_s24 + $0x38] sm:$0xff]  }
  0x14   : > { %v906_v19 = vld [vmem:[%s961_s24 + $0x78] sm:$0xff]  }
  0x15   : > { %839 = vmatpush3.bf16.msra.mxu0 %v890_v3  ;;  %877 = vmatpush3.bf16.msra.mxu1 %v890_v3 }
  0x18   : > { %841 = vmatmul.mubr.msk.bf16.vlgmr.msra.gmra.mxu0 %vm318_vm1, %v892_v5  ;;  %857 = vmatmul.mubr.msk.bf16.vlgmr.msra.gmra.mxu1 %vm318_vm1, %v900_v10 }
  0x19   : > { %844 = vmatprep.mubr.msk.bf16.mxu0 %vm318_vm1, %v893_v6  ;;  %860 = vmatprep.mubr.msk.bf16.mxu1 %vm318_vm1, %v901_v11 }
  0x20   : > { %845 = vmatmul.mubr.msk.bf16.gmra.mxu0 %vm318_vm1, %v894_v7  ;;  %861 = vmatmul.mubr.msk.bf16.gmra.mxu1 %vm318_vm1, %v902_v12 }
  0x21   : > { %848 = vmatprep.mubr.msk.bf16.mxu0 %vm318_vm1, %v895_v8  ;;  %864 = vmatprep.mubr.msk.bf16.mxu1 %vm318_vm1, %v903_v13 }
  0x28   : > { %849 = vmatmul.mubr.msk.bf16.gmra.mxu0 %vm318_vm1, %v896_v14  ;;  %865 = vmatmul.mubr.msk.bf16.gmra.mxu1 %vm318_vm1, %v904_v16 }
  0x29   : > { %852 = vmatprep.mubr.msk.bf16.mxu0 %vm318_vm1, %v897_v15  ;;  %868 = vmatprep.mubr.msk.bf16.mxu1 %vm318_vm1, %v905_v17 }
  0x30   : > { %853 = vmatmul.mubr.msk.bf16.gmra.mxu0 %vm318_vm1, %v898_v18  ;;  %869 = vmatmul.mubr.msk.bf16.gmra.mxu1 %vm318_vm1, %v906_v19 }
  0xd8   : > { %v842_v20 = vpop.f32.mrf.mxu0  ;;  %v1004_v24 = vpop.f32.mrf.mxu1 }
  0xd9   : > { %534 = vst [vmem:[%s999_s28 + $0x10] sm:$0xff] %v842_v20  ;;  %550 = vst [vmem:[%s999_s28 + $0x90] sm:$0xff] %v1004_v24  ;;  %v603_v30 = vmul.f32 %v842_v20, %v842_v20 }
  0xda   : > { %v405_v21 = vpop.f32.mrf.mxu0  ;;  %v1009_v29 = vpop.f32.mrf.mxu1 }
  0xdb   : > { %532 = vst [vmem:[%s999_s28] sm:$0xff] %v405_v21  ;;  %v601_v25 = vmul.f32 %v405_v21, %v405_v21  ;;  %548 = vst [vmem:[%s999_s28 + $0x80] sm:$0xff] %v1009_v29 }
  0xdc   : > { %v843_v22 = vpop.f32.mrf.mxu0  ;;  %v1014_v34 = vpop.f32.mrf.mxu1 }
  0xdd   : > { %535 = vst [vmem:[%s999_s28 + $0x18] sm:$0xff] %v843_v22  ;;  %v604_v35 = vmul.f32 %v843_v22, %v843_v22  ;;  %551 = vst [vmem:[%s999_s28 + $0x98] sm:$0xff] %v1014_v34 }
  0xde   : > { %v408_v23 = vpop.f32.mrf.mxu0  ;;  %v1019_v39 = vpop.f32.mrf.mxu1 }
  0xdf   : > { %533 = vst [vmem:[%s999_s28 + $0x8] sm:$0xff] %v408_v23  ;;  %v564_v26 = vadd.f32 %v408_v23, %v405_v21  ;;  %v602_v27 = vmul.f32 %v408_v23, %v408_v23  ;;  %549 = vst [vmem:[%s999_s28 + $0x88] sm:$0xff] %v1019_v39 }
  0xe0   : > { %v846_v28 = vpop.f32.mrf.mxu0  ;;  %v1024_v44 = vpop.f32.mrf.mxu1 }
  0xe1   : > { %v565_v31 = vadd.f32 %v842_v20, %v564_v26  ;;  %v633_v32 = vadd.f32 %v602_v27, %v601_v25  ;;  %538 = vst [vmem:[%s999_s28 + $0x30] sm:$0xff] %v846_v28  ;;  %554 = vst [vmem:[%s999_s28 + $0xb0] sm:$0xff] %v1024_v44  ;;  %v607_v50 = vmul.f32 %v846_v28, %v846_v28 }
  0xe2   : > { %v421_v33 = vpop.f32.mrf.mxu0  ;;  %v1029_v49 = vpop.f32.mrf.mxu1 }
  0xe3   : > { %v634_v36 = vadd.f32 %v633_v32, %v603_v30  ;;  %536 = vst [vmem:[%s999_s28 + $0x20] sm:$0xff] %v421_v33  ;;  %v566_v37 = vadd.f32 %v843_v22, %v565_v31  ;;  %v605_v41 = vmul.f32 %v421_v33, %v421_v33  ;;  %552 = vst [vmem:[%s999_s28 + $0xa0] sm:$0xff] %v1029_v49 }
  0xe4   : > { %v847_v38 = vpop.f32.mrf.mxu0  ;;  %v1034_v54 = vpop.f32.mrf.mxu1 }
  0xe5   : > { %v567_v40 = vadd.f32 %v566_v37, %v421_v33  ;;  %v635_v42 = vadd.f32 %v634_v36, %v604_v35  ;;  %539 = vst [vmem:[%s999_s28 + $0x38] sm:$0xff] %v847_v38  ;;  %v608_v55 = vmul.f32 %v847_v38, %v847_v38  ;;  %555 = vst [vmem:[%s999_s28 + $0xb8] sm:$0xff] %v1034_v54 }
  0xe6   : > { %v424_v43 = vpop.f32.mrf.mxu0  ;;  %v1039_v59 = vpop.f32.mrf.mxu1  ;;  %v617_v36 = vmul.f32 %v1009_v29, %v1009_v29 }
  0xe7   : > { %v636_v45 = vadd.f32 %v635_v42, %v605_v41  ;;  %537 = vst [vmem:[%s999_s28 + $0x28] sm:$0xff] %v424_v43  ;;  %v568_v46 = vadd.f32 %v567_v40, %v424_v43  ;;  %v606_v47 = vmul.f32 %v424_v43, %v424_v43  ;;  %553 = vst [vmem:[%s999_s28 + $0xa8] sm:$0xff] %v1039_v59 }
  0xe8   : > { %v850_v48 = vpop.f32.mrf.mxu0  ;;  %v1044_v0 = vpop.f32.mrf.mxu1  ;;  %v618_v41 = vmul.f32 %v1019_v39, %v1019_v39  ;;  %v619_v43 = vmul.f32 %v1004_v24, %v1004_v24 }
  0xe9   : > { %v569_v51 = vadd.f32 %v846_v28, %v568_v46  ;;  %v637_v52 = vadd.f32 %v636_v45, %v606_v47  ;;  %542 = vst [vmem:[%s999_s28 + $0x50] sm:$0xff] %v850_v48  ;;  %558 = vst [vmem:[%s999_s28 + $0xd0] sm:$0xff] %v1044_v0  ;;  %v611_v6 = vmul.f32 %v850_v48, %v850_v48 }
  0xea   : > { %v437_v53 = vpop.f32.mrf.mxu0  ;;  %v1049_v5 = vpop.f32.mrf.mxu1  ;;  %v620_v47 = vmul.f32 %v1014_v34, %v1014_v34 }
  0xeb   : > { %v638_v56 = vadd.f32 %v637_v52, %v607_v50  ;;  %540 = vst [vmem:[%s999_s28 + $0x40] sm:$0xff] %v437_v53  ;;  %v570_v57 = vadd.f32 %v847_v38, %v569_v51  ;;  %v609_v61 = vmul.f32 %v437_v53, %v437_v53  ;;  %556 = vst [vmem:[%s999_s28 + $0xc0] sm:$0xff] %v1049_v5 }
  0xec   : > { %v851_v58 = vpop.f32.mrf.mxu0  ;;  %v1054_v10 = vpop.f32.mrf.mxu1  ;;  %v621_v51 = vmul.f32 %v1029_v49, %v1029_v49 }
  0xed   : > { %v571_v60 = vadd.f32 %v570_v57, %v437_v53  ;;  %v639_v62 = vadd.f32 %v638_v56, %v608_v55  ;;  %543 = vst [vmem:[%s999_s28 + $0x58] sm:$0xff] %v851_v58  ;;  %v612_v11 = vmul.f32 %v851_v58, %v851_v58  ;;  %559 = vst [vmem:[%s999_s28 + $0xd8] sm:$0xff] %v1054_v10 }
  0xee   : > { %v440_v63 = vpop.f32.mrf.mxu0  ;;  %v504_v15 = vpop.f32.mrf.mxu1  ;;  %v622_v55 = vmul.f32 %v1039_v59, %v1039_v59 }
  0xef   : > { %v640_v1 = vadd.f32 %v639_v62, %v609_v61  ;;  %541 = vst [vmem:[%s999_s28 + $0x48] sm:$0xff] %v440_v63  ;;  %v572_v2 = vadd.f32 %v571_v60, %v440_v63  ;;  %v610_v3 = vmul.f32 %v440_v63, %v440_v63  ;;  %557 = vst [vmem:[%s999_s28 + $0xc8] sm:$0xff] %v504_v15 }
  0xf0   : > { %v854_v4 = vpop.f32.mrf.mxu0  ;;  %v870_v20 = vpop.f32.mrf.mxu1  ;;  %v625_v61 = vmul.f32 %v1049_v5, %v1049_v5 }
  0xf1   : > { %v573_v7 = vadd.f32 %v850_v48, %v572_v2  ;;  %v641_v8 = vadd.f32 %v640_v1, %v610_v3  ;;  %546 = vst [vmem:[%s999_s28 + $0x70] sm:$0xff] %v854_v4  ;;  %562 = vst [vmem:[%s999_s28 + $0xf0] sm:$0xff] %v870_v20  ;;  %v615_v26 = vmul.f32 %v854_v4, %v854_v4 }
  0xf2   : > { %v453_v9 = vpop.f32.mrf.mxu0  ;;  %v517_v25 = vpop.f32.mrf.mxu1  ;;  %v626_v1 = vmul.f32 %v504_v15, %v504_v15  ;;  %v627_v2 = vmul.f32 %v1044_v0, %v1044_v0 }
  0xf3   : > { %v642_v12 = vadd.f32 %v641_v8, %v611_v6  ;;  %544 = vst [vmem:[%s999_s28 + $0x60] sm:$0xff] %v453_v9  ;;  %v574_v13 = vadd.f32 %v851_v58, %v573_v7  ;;  %v613_v17 = vmul.f32 %v453_v9, %v453_v9  ;;  %560 = vst [vmem:[%s999_s28 + $0xe0] sm:$0xff] %v517_v25 }
  0xf4   : > { %v855_v14 = vpop.f32.mrf.mxu0  ;;  %v871_v30 = vpop.f32.mrf.mxu1  ;;  %v629_v8 = vmul.f32 %v517_v25, %v517_v25 }
  0xf5   : > { %v575_v16 = vadd.f32 %v574_v13, %v453_v9  ;;  %v643_v18 = vadd.f32 %v642_v12, %v612_v11  ;;  %547 = vst [vmem:[%s999_s28 + $0x78] sm:$0xff] %v855_v14  ;;  %v616_v31 = vmul.f32 %v855_v14, %v855_v14  ;;  %563 = vst [vmem:[%s999_s28 + $0xf8] sm:$0xff] %v871_v30 }
  0xf6   : > { %v456_v19 = vpop.f32.mrf.mxu0  ;;  %v520_v35 = vpop.f32.mrf.mxu1  ;;  %v631_v13 = vmul.f32 %v870_v20, %v870_v20 }
  0xf7   : > { %v644_v21 = vadd.f32 %v643_v18, %v613_v17  ;;  %545 = vst [vmem:[%s999_s28 + $0x68] sm:$0xff] %v456_v19  ;;  %v576_v22 = vadd.f32 %v575_v16, %v456_v19  ;;  %v614_v23 = vmul.f32 %v456_v19, %v456_v19  ;;  %561 = vst [vmem:[%s999_s28 + $0xe8] sm:$0xff] %v520_v35 }
  0xf8   : > { %v630_v12 = vmul.f32 %v520_v35, %v520_v35  ;;  %v632_v16 = vmul.f32 %v871_v30, %v871_v30 }
  0xf9   : > { %v577_v27 = vadd.f32 %v854_v4, %v576_v22  ;;  %v645_v28 = vadd.f32 %v644_v21, %v614_v23  ;;  %v628_v4 = vmul.f32 %v1054_v10, %v1054_v10  ;;  %v670_v23 = vlaneseq }
  0xfb   : > { %v578_v32 = vadd.f32 %v855_v14, %v577_v27  ;;  %v646_v33 = vadd.f32 %v645_v28, %v615_v26  ;;  %v671_v28 = vshrl.u32 %v670_v23, 7 }
  0xfd   : > { %v647_v37 = vadd.f32 %v646_v33, %v616_v31  ;;  %v579_v38 = vadd.f32 %v578_v32, %v1009_v29  ;;  %vm673_vm2 = vcmp.eq.s32.totalorder %v671_v28, 1  ;;  %vm672_vm3 = vcmp.eq.s32.totalorder %v671_v28, 0 }
  0xff   : > { %v580_v40 = vadd.f32 %v579_v38, %v1019_v39  ;;  %v648_v42 = vadd.f32 %v647_v37, %v617_v36 }
 0x101   : > { %v581_v45 = vadd.f32 %v1004_v24, %v580_v40  ;;  %v649_v46 = vadd.f32 %v648_v42, %v618_v41  ;;  %v623_v24 = vmul.f32 %v1024_v44, %v1024_v44 }
 0x103   : > { %v650_v48 = vadd.f32 %v649_v46, %v619_v43  ;;  %v582_v50 = vadd.f32 %v1014_v34, %v581_v45  ;;  %v624_v34 = vmul.f32 %v1034_v54, %v1034_v54 }
 0x105   : > { %v583_v29 = vadd.f32 %v582_v50, %v1029_v49  ;;  %v651_v52 = vadd.f32 %v650_v48, %v620_v47 }
 0x107   : > { %v652_v39 = vadd.f32 %v651_v52, %v621_v51  ;;  %v584_v53 = vadd.f32 %v583_v29, %v1039_v59 }
 0x109   : > { %v585_v56 = vadd.f32 %v1024_v44, %v584_v53  ;;  %v653_v57 = vadd.f32 %v652_v39, %v622_v55 }
 0x10b   : > { %v654_v58 = vadd.f32 %v653_v57, %v623_v24  ;;  %v586_v60 = vadd.f32 %v1034_v54, %v585_v56 }
 0x10d   : > { %v587_v49 = vadd.f32 %v586_v60, %v1049_v5  ;;  %v655_v62 = vadd.f32 %v654_v58, %v624_v34 }
 0x10f   : > { %v656_v63 = vadd.f32 %v655_v62, %v625_v61  ;;  %v588_v59 = vadd.f32 %v587_v49, %v504_v15 }
 0x111   : > { %v589_v44 = vadd.f32 %v1044_v0, %v588_v59  ;;  %v657_v3 = vadd.f32 %v656_v63, %v626_v1 }
 0x113   : > { %v658_v6 = vadd.f32 %v657_v3, %v627_v2  ;;  %v590_v54 = vadd.f32 %v1054_v10, %v589_v44 }
 0x115   : > { %v591_v7 = vadd.f32 %v590_v54, %v517_v25  ;;  %v659_v5 = vadd.f32 %v658_v6, %v628_v4 }
 0x117   : > { %v660_v9 = vadd.f32 %v659_v5, %v629_v8  ;;  %v592_v11 = vadd.f32 %v591_v7, %v520_v35 }
 0x119   : > { %v593_v14 = vadd.f32 %v870_v20, %v592_v11  ;;  %v661_v15 = vadd.f32 %v660_v9, %v630_v12 }
 0x11b   : > { %v594_v0 = vadd.f32 %v871_v30, %v593_v14  ;;  %v662_v17 = vadd.f32 %v661_v15, %v631_v13 }
 0x11d   : > { %v595_v18 = vrot.slane %v594_v0, 4  ;;  %v663_v19 = vadd.f32 %v662_v17, %v632_v16 }
 0x11f   : > { %v596_v21 = vadd.f32 %v595_v18, %v594_v0  ;;  %v664_v22 = vrot.slane %v663_v19, 4 }
 0x121   : > { %v597_v10 = vrot.slane %v596_v21, 2  ;;  %v665_v26 = vadd.f32 %v664_v22, %v663_v19 }
 0x123   : > { %v598_v25 = vadd.f32 %v597_v10, %v596_v21  ;;  %v666_v27 = vrot.slane %v665_v26, 2 }
 0x125   : > { %v667_v31 = vadd.f32 %v666_v27, %v665_v26  ;;  %v599_v32 = vrot.slane %v598_v25, 1 }
 0x127   : > { %v668_v20 = vrot.slane %v667_v31, 1  ;;  %v600_v30 = vadd.f32 %v599_v32, %v598_v25 }
 0x129   : > { %v669_v33 = vadd.f32 %v668_v20, %v667_v31 }
 0x12b   : > { %v676_v35 = vsel %vm673_vm2, %v669_v33, 0.0 }
 0x12c   : > { %v679_v36 = vsel %vm672_vm3, %v600_v30, %v676_v35 }
 0x12d   : > { %680 = vst [vmem:[%s184_s5] sm:$0xff] %v679_v36 }
 0x12e PF: > { %s14_s12 = sadd.s32 1, %s913_s12  }
 0x12f   : > { %p11_p5 = scmp.ge.s32.totalorder %s14_s12, 4  }
 0x131   :  { %13 = sbr.rel (!%p11_p5) target bundleno = 1 (0x1), region = 70 }

// kernel: _lambda_.6
= control target key start
LH: loop header
LB: loop body
LE: loop exit
PB: predicated region body
PF: predicated region fallthrough
CT: control target
= control target key end

     0   :  { %s965_s12 = smov 0   ;;  %s1161_s0 = inlined_call_operand.vmem [shape: bf16[512,72], index: 0, kind: input, shape index: {}]   ;;  %s1162_s1 = inlined_call_operand.vmem [shape: bf16[72,128], index: 1, kind: input, shape index: {}]   ;;  %s1163_s2 = inlined_call_operand.vmem [shape: f32[512,128], index: 2, kind: output, shape index: {0}]   ;;  %s1164_s3 = inlined_call_operand.vmem [shape: f32[16,128], index: 3, kind: output, shape index: {1}]  }
   0x1 LB: > { %s971_s13 = sadd.s32 4294967295, %s943_s12   ;;  %p788_p0 = scmp.ge.s32.totalorder %s943_s12, 1  ;;  %s943_s12 = sphi %s965_s12, %s14_s12  }
   0x2   : > { %p141_p1 = scmp.lt.s32.totalorder %s943_s12, 3 }
   0x4   : > { %p142_p2 = pnand %p788_p0, %p141_p1 }
   0x5   : > { %s789_s18 = sshll.u32 (!%p142_p2), %s971_s13, 5  ;;  %p181_p4 = scmp.lt.s32.totalorder (!%p142_p2), %s971_s13, 1 }
   0x6   : > { %145 = sbr.rel (%p142_p2) target bundleno = 310 (0x136), region = 28  ;;  %p170_p3 = scmp.lt.s32.totalorder (!%p142_p2), %s789_s18, 63 }
   0xb   : > { %v916_v0 = vld [vmem:[%s1162_s1 + $0x20] ss:$0 sps:$4 sm:$0xff]   ;;  %vm383_vm0 = vcmask 1043456   ;;  %v917_v1 = vld [vmem:[%s1162_s1 + $0x18] sm:$0xff]   ;;  %v918_v3 = vld [vmem:[%s1162_s1 + $0x10] sm:$0xff]   ;;  %s1166_s18 = smov (!%p170_p3, %s789_s18), 63 }
   0xc   : > { %906 = vmatprep.subr.msk.bf16.mxu0 %vm383_vm0, %v916_v0  ;;  %v385_v2 = vsel %vm383_vm0, %v916_v0, 0  ;;  %907 = vmatprep.subr.msk.bf16.mxu1 %vm383_vm0, %v916_v0  ;;  %v919_v4 = vld [vmem:[%s1162_s1 + $0x8] sm:$0xff]   ;;  %s790_s23 = sshll.u32 %s1166_s18, 2  ;;  %vm334_vm1 = vcmask 588800   ;;  %v920_v6 = vld [vmem:[%s1162_s1] sm:$0xff]   ;;  %s792_s29 = sshll.u32 %s1166_s18, 3 }
   0xd   : > { %855 = vmatpush3.bf16.msra.mxu0 %v385_v2  ;;  %901 = vmatpush3.bf16.msra.mxu1 %v385_v2  ;;  %s994_s26 = scalar_lea.vmem %s1161_s0, %s790_s23  ;;  %s1035_s5 = scalar_lea.vmem %s1163_s2, %s792_s29 }
   0xe   : > { %856 = vmatprep.subr.bf16.mxu0 %v917_v1  ;;  %897 = vmatprep.subr.bf16.mxu1 %v917_v1  ;;  %v921_v5 = vld [vmem:[%s994_s26] sm:$0xff]   ;;  %v922_v7 = vld [vmem:[%s994_s26 + $0x8] sm:$0xff]   ;;  %v923_v8 = vld [vmem:[%s994_s26 + $0x10] sm:$0xff]   ;;  %s1168_s13 = smov (!%p181_p4, %s971_s13), 1 }
   0xf   : > { %864 = vmatprep.mubr.msk.bf16.mxu0 %vm334_vm1, %v921_v5  ;;  %v929_v9 = vld [vmem:[%s994_s26 + $0x40] sm:$0xff]   ;;  %v930_v10 = vld [vmem:[%s994_s26 + $0x48] sm:$0xff]   ;;  %v931_v11 = vld [vmem:[%s994_s26 + $0x50] sm:$0xff]   ;;  %s793_s6 = sshll.u32 %s1168_s13, 3 }
  0x10   : > { %880 = vmatprep.mubr.msk.bf16.mxu1 %vm334_vm1, %v929_v9  ;;  %v924_v12 = vld [vmem:[%s994_s26 + $0x18] sm:$0xff]   ;;  %v925_v14 = vld [vmem:[%s994_s26 + $0x20] sm:$0xff]   ;;  %v926_v16 = vld [vmem:[%s994_s26 + $0x28] sm:$0xff]   ;;  %s184_s9 = scalar_lea.vmem %s1164_s3, %s793_s6 }
  0x11   : > { %857 = vmatpush3.bf16.msra.mxu0 %v917_v1  ;;  %902 = vmatpush3.bf16.msra.mxu1 %v917_v1  ;;  %v932_v13 = vld [vmem:[%s994_s26 + $0x58] sm:$0xff]   ;;  %v933_v15 = vld [vmem:[%s994_s26 + $0x60] sm:$0xff]   ;;  %v934_v17 = vld [vmem:[%s994_s26 + $0x68] sm:$0xff]  }
  0x12   : > { %858 = vmatprep.subr.bf16.mxu0 %v918_v3  ;;  %898 = vmatprep.subr.bf16.mxu1 %v918_v3  ;;  %v927_v18 = vld [vmem:[%s994_s26 + $0x30] sm:$0xff]   ;;  %v928_v20 = vld [vmem:[%s994_s26 + $0x38] sm:$0xff]  }
  0x13   : > { %v935_v19 = vld [vmem:[%s994_s26 + $0x70] sm:$0xff]   ;;  %v936_v21 = vld [vmem:[%s994_s26 + $0x78] sm:$0xff]  }
  0x15   : > { %859 = vmatpush3.bf16.msra.mxu0 %v918_v3  ;;  %903 = vmatpush3.bf16.msra.mxu1 %v918_v3 }
  0x16   : > { %860 = vmatprep.subr.bf16.mxu0 %v919_v4  ;;  %899 = vmatprep.subr.bf16.mxu1 %v919_v4 }
  0x19   : > { %861 = vmatpush3.bf16.msra.mxu0 %v919_v4  ;;  %904 = vmatpush3.bf16.msra.mxu1 %v919_v4 }
  0x1a   : > { %862 = vmatprep.subr.bf16.mxu0 %v920_v6  ;;  %900 = vmatprep.subr.bf16.mxu1 %v920_v6 }
  0x1d   : > { %863 = vmatpush3.bf16.msra.mxu0 %v920_v6  ;;  %905 = vmatpush3.bf16.msra.mxu1 %v920_v6 }
  0x20   : > { %865 = vmatmul.mubr.msk.bf16.vlgmr.msra.gmra.mxu0 %vm334_vm1, %v922_v7  ;;  %881 = vmatmul.mubr.msk.bf16.vlgmr.msra.gmra.mxu1 %vm334_vm1, %v930_v10 }
  0x21   : > { %868 = vmatprep.mubr.msk.bf16.mxu0 %vm334_vm1, %v923_v8  ;;  %884 = vmatprep.mubr.msk.bf16.mxu1 %vm334_vm1, %v931_v11 }
  0x28   : > { %869 = vmatmul.mubr.msk.bf16.gmra.mxu0 %vm334_vm1, %v924_v12  ;;  %885 = vmatmul.mubr.msk.bf16.gmra.mxu1 %vm334_vm1, %v932_v13 }
  0x29   : > { %872 = vmatprep.mubr.msk.bf16.mxu0 %vm334_vm1, %v925_v14  ;;  %888 = vmatprep.mubr.msk.bf16.mxu1 %vm334_vm1, %v933_v15 }
  0x30   : > { %873 = vmatmul.mubr.msk.bf16.gmra.mxu0 %vm334_vm1, %v926_v16  ;;  %889 = vmatmul.mubr.msk.bf16.gmra.mxu1 %vm334_vm1, %v934_v17 }
  0x31   : > { %876 = vmatprep.mubr.msk.bf16.mxu0 %vm334_vm1, %v927_v18  ;;  %892 = vmatprep.mubr.msk.bf16.mxu1 %vm334_vm1, %v935_v19 }
  0x38   : > { %877 = vmatmul.mubr.msk.bf16.gmra.mxu0 %vm334_vm1, %v928_v20  ;;  %893 = vmatmul.mubr.msk.bf16.gmra.mxu1 %vm334_vm1, %v936_v21 }
  0xe0   : > { %v866_v22 = vpop.f32.mrf.mxu0  ;;  %v1037_v23 = vpop.f32.mrf.mxu1 }
  0xe1   : > { %550 = vst [vmem:[%s1035_s5 + $0x10] sm:$0xff] %v866_v22  ;;  %566 = vst [vmem:[%s1035_s5 + $0x90] sm:$0xff] %v1037_v23  ;;  %v619_v35 = vmul.f32 %v866_v22, %v866_v22 }
  0xe2   : > { %v421_v24 = vpop.f32.mrf.mxu0  ;;  %v1042_v25 = vpop.f32.mrf.mxu1 }
  0xe3   : > { %548 = vst [vmem:[%s1035_s5] sm:$0xff] %v421_v24  ;;  %564 = vst [vmem:[%s1035_s5 + $0x80] sm:$0xff] %v1042_v25  ;;  %v617_v30 = vmul.f32 %v421_v24, %v421_v24 }
  0xe4   : > { %v867_v26 = vpop.f32.mrf.mxu0  ;;  %v1047_v27 = vpop.f32.mrf.mxu1 }
  0xe5   : > { %551 = vst [vmem:[%s1035_s5 + $0x18] sm:$0xff] %v867_v26  ;;  %567 = vst [vmem:[%s1035_s5 + $0x98] sm:$0xff] %v1047_v27  ;;  %v620_v40 = vmul.f32 %v867_v26, %v867_v26 }
  0xe6   : > { %v424_v28 = vpop.f32.mrf.mxu0  ;;  %v1052_v29 = vpop.f32.mrf.mxu1 }
  0xe7   : > { %549 = vst [vmem:[%s1035_s5 + $0x8] sm:$0xff] %v424_v28  ;;  %v580_v31 = vadd.f32 %v424_v28, %v421_v24  ;;  %v618_v32 = vmul.f32 %v424_v28, %v424_v28  ;;  %565 = vst [vmem:[%s1035_s5 + $0x88] sm:$0xff] %v1052_v29 }
  0xe8   : > { %v870_v33 = vpop.f32.mrf.mxu0  ;;  %v1057_v34 = vpop.f32.mrf.mxu1 }
  0xe9   : > { %v581_v36 = vadd.f32 %v866_v22, %v580_v31  ;;  %v649_v37 = vadd.f32 %v618_v32, %v617_v30  ;;  %554 = vst [vmem:[%s1035_s5 + $0x30] sm:$0xff] %v870_v33  ;;  %570 = vst [vmem:[%s1035_s5 + $0xb0] sm:$0xff] %v1057_v34  ;;  %v623_v55 = vmul.f32 %v870_v33, %v870_v33 }
  0xea   : > { %v437_v38 = vpop.f32.mrf.mxu0  ;;  %v1062_v39 = vpop.f32.mrf.mxu1 }
  0xeb   : > { %v650_v41 = vadd.f32 %v649_v37, %v619_v35  ;;  %552 = vst [vmem:[%s1035_s5 + $0x20] sm:$0xff] %v437_v38  ;;  %v582_v42 = vadd.f32 %v867_v26, %v581_v36  ;;  %568 = vst [vmem:[%s1035_s5 + $0xa0] sm:$0xff] %v1062_v39  ;;  %v621_v46 = vmul.f32 %v437_v38, %v437_v38 }
  0xec   : > { %v871_v43 = vpop.f32.mrf.mxu0  ;;  %v1067_v44 = vpop.f32.mrf.mxu1 }
  0xed   : > { %v583_v45 = vadd.f32 %v582_v42, %v437_v38  ;;  %v651_v47 = vadd.f32 %v650_v41, %v620_v40  ;;  %555 = vst [vmem:[%s1035_s5 + $0x38] sm:$0xff] %v871_v43  ;;  %571 = vst [vmem:[%s1035_s5 + $0xb8] sm:$0xff] %v1067_v44  ;;  %v624_v60 = vmul.f32 %v871_v43, %v871_v43 }
  0xee   : > { %v440_v48 = vpop.f32.mrf.mxu0  ;;  %v1072_v49 = vpop.f32.mrf.mxu1  ;;  %v633_v41 = vmul.f32 %v1042_v25, %v1042_v25 }
  0xef   : > { %v652_v50 = vadd.f32 %v651_v47, %v621_v46  ;;  %553 = vst [vmem:[%s1035_s5 + $0x28] sm:$0xff] %v440_v48  ;;  %v584_v51 = vadd.f32 %v583_v45, %v440_v48  ;;  %v622_v52 = vmul.f32 %v440_v48, %v440_v48  ;;  %569 = vst [vmem:[%s1035_s5 + $0xa8] sm:$0xff] %v1072_v49 }
  0xf0   : > { %v874_v53 = vpop.f32.mrf.mxu0  ;;  %v1077_v54 = vpop.f32.mrf.mxu1  ;;  %v634_v46 = vmul.f32 %v1052_v29, %v1052_v29  ;;  %v635_v48 = vmul.f32 %v1037_v23, %v1037_v23 }
  0xf1   : > { %v585_v56 = vadd.f32 %v870_v33, %v584_v51  ;;  %v653_v57 = vadd.f32 %v652_v50, %v622_v52  ;;  %558 = vst [vmem:[%s1035_s5 + $0x50] sm:$0xff] %v874_v53  ;;  %574 = vst [vmem:[%s1035_s5 + $0xd0] sm:$0xff] %v1077_v54  ;;  %v627_v11 = vmul.f32 %v874_v53, %v874_v53 }
  0xf2   : > { %v453_v58 = vpop.f32.mrf.mxu0  ;;  %v1082_v59 = vpop.f32.mrf.mxu1  ;;  %v636_v52 = vmul.f32 %v1047_v27, %v1047_v27 }
  0xf3   : > { %v654_v61 = vadd.f32 %v653_v57, %v623_v55  ;;  %556 = vst [vmem:[%s1035_s5 + $0x40] sm:$0xff] %v453_v58  ;;  %v586_v62 = vadd.f32 %v871_v43, %v585_v56  ;;  %572 = vst [vmem:[%s1035_s5 + $0xc0] sm:$0xff] %v1082_v59  ;;  %v625_v2 = vmul.f32 %v453_v58, %v453_v58 }
  0xf4   : > { %v875_v63 = vpop.f32.mrf.mxu0  ;;  %v1087_v0 = vpop.f32.mrf.mxu1  ;;  %v637_v56 = vmul.f32 %v1062_v39, %v1062_v39 }
  0xf5   : > { %v587_v1 = vadd.f32 %v586_v62, %v453_v58  ;;  %v655_v3 = vadd.f32 %v654_v61, %v624_v60  ;;  %559 = vst [vmem:[%s1035_s5 + $0x58] sm:$0xff] %v875_v63  ;;  %575 = vst [vmem:[%s1035_s5 + $0xd8] sm:$0xff] %v1087_v0  ;;  %v628_v16 = vmul.f32 %v875_v63, %v875_v63 }
  0xf6   : > { %v456_v4 = vpop.f32.mrf.mxu0  ;;  %v1092_v5 = vpop.f32.mrf.mxu1  ;;  %v638_v60 = vmul.f32 %v1072_v49, %v1072_v49 }
  0xf7   : > { %v656_v6 = vadd.f32 %v655_v3, %v625_v2  ;;  %557 = vst [vmem:[%s1035_s5 + $0x48] sm:$0xff] %v456_v4  ;;  %v588_v7 = vadd.f32 %v587_v1, %v456_v4  ;;  %v626_v8 = vmul.f32 %v456_v4, %v456_v4  ;;  %573 = vst [vmem:[%s1035_s5 + $0xc8] sm:$0xff] %v1092_v5 }
  0xf8   : > { %v878_v9 = vpop.f32.mrf.mxu0  ;;  %v1097_v10 = vpop.f32.mrf.mxu1  ;;  %v641_v2 = vmul.f32 %v1082_v59, %v1082_v59 }
  0xf9   : > { %v589_v12 = vadd.f32 %v874_v53, %v588_v7  ;;  %v657_v13 = vadd.f32 %v656_v6, %v626_v8  ;;  %562 = vst [vmem:[%s1035_s5 + $0x70] sm:$0xff] %v878_v9  ;;  %578 = vst [vmem:[%s1035_s5 + $0xf0] sm:$0xff] %v1097_v10  ;;  %v631_v33 = vmul.f32 %v878_v9, %v878_v9 }
  0xfa   : > { %v469_v14 = vpop.f32.mrf.mxu0  ;;  %v533_v15 = vpop.f32.mrf.mxu1  ;;  %v642_v6 = vmul.f32 %v1092_v5, %v1092_v5 }
  0xfb   : > { %v658_v17 = vadd.f32 %v657_v13, %v627_v11  ;;  %560 = vst [vmem:[%s1035_s5 + $0x60] sm:$0xff] %v469_v14  ;;  %v590_v18 = vadd.f32 %v875_v63, %v589_v12  ;;  %576 = vst [vmem:[%s1035_s5 + $0xe0] sm:$0xff] %v533_v15  ;;  %v629_v22 = vmul.f32 %v469_v14, %v469_v14 }
  0xfc   : > { %v879_v19 = vpop.f32.mrf.mxu0  ;;  %v1104_v20 = vpop.f32.mrf.mxu1  ;;  %v645_v12 = vmul.f32 %v533_v15, %v533_v15 }
  0xfd   : > { %v591_v21 = vadd.f32 %v590_v18, %v469_v14  ;;  %v659_v24 = vadd.f32 %v658_v17, %v628_v16  ;;  %563 = vst [vmem:[%s1035_s5 + $0x78] sm:$0xff] %v879_v19  ;;  %579 = vst [vmem:[%s1035_s5 + $0xf8] sm:$0xff] %v1104_v20  ;;  %v632_v37 = vmul.f32 %v879_v19, %v879_v19 }
  0xfe   : > { %v472_v26 = vpop.f32.mrf.mxu0  ;;  %v536_v28 = vpop.f32.mrf.mxu1  ;;  %v647_v17 = vmul.f32 %v1097_v10, %v1097_v10 }
  0xff   : > { %v660_v30 = vadd.f32 %v659_v24, %v629_v22  ;;  %561 = vst [vmem:[%s1035_s5 + $0x68] sm:$0xff] %v472_v26  ;;  %v592_v31 = vadd.f32 %v591_v21, %v472_v26  ;;  %v630_v32 = vmul.f32 %v472_v26, %v472_v26  ;;  %577 = vst [vmem:[%s1035_s5 + $0xe8] sm:$0xff] %v536_v28 }
 0x101   : > { %v593_v35 = vadd.f32 %v878_v9, %v592_v31  ;;  %v661_v36 = vadd.f32 %v660_v30, %v630_v32  ;;  %v686_v30 = vlaneseq }
 0x103   : > { %v594_v38 = vadd.f32 %v879_v19, %v593_v35  ;;  %v662_v40 = vadd.f32 %v661_v36, %v631_v33  ;;  %v648_v19 = vmul.f32 %v1104_v20, %v1104_v20  ;;  %v687_v35 = vshrl.u32 %v686_v30, 7 }
 0x105   : > { %v663_v42 = vadd.f32 %v662_v40, %v632_v37  ;;  %v595_v43 = vadd.f32 %v594_v38, %v1042_v25  ;;  %vm689_vm2 = vcmp.eq.s32.totalorder %v687_v35, 1  ;;  %vm688_vm3 = vcmp.eq.s32.totalorder %v687_v35, 0 }
 0x107   : > { %v596_v45 = vadd.f32 %v595_v43, %v1052_v29  ;;  %v664_v47 = vadd.f32 %v663_v42, %v633_v41 }
 0x109   : > { %v597_v50 = vadd.f32 %v1037_v23, %v596_v45  ;;  %v665_v51 = vadd.f32 %v664_v47, %v634_v46  ;;  %v639_v23 = vmul.f32 %v1057_v34, %v1057_v34 }
 0x10b   : > { %v666_v53 = vadd.f32 %v665_v51, %v635_v48  ;;  %v598_v55 = vadd.f32 %v1047_v27, %v597_v50  ;;  %v640_v27 = vmul.f32 %v1067_v44, %v1067_v44 }
 0x10d   : > { %v599_v25 = vadd.f32 %v598_v55, %v1062_v39  ;;  %v667_v57 = vadd.f32 %v666_v53, %v636_v52 }
 0x10f   : > { %v668_v29 = vadd.f32 %v667_v57, %v637_v56  ;;  %v600_v58 = vadd.f32 %v599_v25, %v1072_v49 }
 0x111   : > { %v601_v61 = vadd.f32 %v1057_v34, %v600_v58  ;;  %v669_v62 = vadd.f32 %v668_v29, %v638_v60  ;;  %v643_v34 = vmul.f32 %v1077_v54, %v1077_v54 }
 0x113   : > { %v670_v63 = vadd.f32 %v669_v62, %v639_v23  ;;  %v602_v1 = vadd.f32 %v1067_v44, %v601_v61  ;;  %v644_v44 = vmul.f32 %v1087_v0, %v1087_v0 }
 0x115   : > { %v603_v39 = vadd.f32 %v602_v1, %v1082_v59  ;;  %v671_v3 = vadd.f32 %v670_v63, %v640_v27 }
 0x117   : > { %v672_v4 = vadd.f32 %v671_v3, %v641_v2  ;;  %v604_v49 = vadd.f32 %v603_v39, %v1092_v5  ;;  %v646_v5 = vmul.f32 %v536_v28, %v536_v28 }
 0x119   : > { %v605_v7 = vadd.f32 %v1077_v54, %v604_v49  ;;  %v673_v8 = vadd.f32 %v672_v4, %v642_v6 }
 0x11b   : > { %v674_v9 = vadd.f32 %v673_v8, %v643_v34  ;;  %v606_v59 = vadd.f32 %v1087_v0, %v605_v7 }
 0x11d   : > { %v607_v11 = vadd.f32 %v606_v59, %v533_v15  ;;  %v675_v13 = vadd.f32 %v674_v9, %v644_v44 }
 0x11f   : > { %v676_v14 = vadd.f32 %v675_v13, %v645_v12  ;;  %v608_v16 = vadd.f32 %v607_v11, %v536_v28 }
 0x121   : > { %v609_v54 = vadd.f32 %v1097_v10, %v608_v16  ;;  %v677_v18 = vadd.f32 %v676_v14, %v646_v5 }
 0x123   : > { %v610_v21 = vadd.f32 %v1104_v20, %v609_v54  ;;  %v678_v22 = vadd.f32 %v677_v18, %v647_v17 }
 0x125   : > { %v611_v0 = vrot.slane %v610_v21, 4  ;;  %v679_v24 = vadd.f32 %v678_v22, %v648_v19 }
 0x127   : > { %v612_v15 = vadd.f32 %v611_v0, %v610_v21  ;;  %v680_v26 = vrot.slane %v679_v24, 4 }
 0x129   : > { %v613_v31 = vrot.slane %v612_v15, 2  ;;  %v681_v28 = vadd.f32 %v680_v26, %v679_v24 }
 0x12b   : > { %v614_v32 = vadd.f32 %v613_v31, %v612_v15  ;;  %v682_v33 = vrot.slane %v681_v28, 2 }
 0x12d   : > { %v683_v10 = vadd.f32 %v682_v33, %v681_v28  ;;  %v615_v36 = vrot.slane %v614_v32, 1 }
 0x12f   : > { %v684_v37 = vrot.slane %v683_v10, 1  ;;  %v616_v20 = vadd.f32 %v615_v36, %v614_v32 }
 0x131   : > { %v685_v38 = vadd.f32 %v684_v37, %v683_v10 }
 0x133   : > { %v692_v40 = vsel %vm689_vm2, %v685_v38, 0.0 }
 0x134   : > { %v695_v41 = vsel %vm688_vm3, %v616_v20, %v692_v40 }
 0x135   : > { %696 = vst [vmem:[%s184_s9] sm:$0xff] %v695_v41 }
 0x136 PF: > { %s14_s12 = sadd.s32 1, %s943_s12  }
 0x137   : > { %p11_p5 = scmp.ge.s32.totalorder %s14_s12, 4  }
 0x139   :  { %13 = sbr.rel (!%p11_p5) target bundleno = 1 (0x1), region = 70 }

</bundles_post_ra>
